<compile_context>
chip_gen: v7x
topology: tpu7x:2x2x1
jax: 0.10.0
libtpu: 0.0.40
codegen_flags: <defaults>
</compile_context>

<pallas_src>
import functools

import jax
import jax.numpy as jnp
from jax import lax
from jax.experimental import pallas as pl
from jax.experimental.pallas import tpu as pltpu


@functools.lru_cache(maxsize=None)
def _vmem_capacity_bytes():
    """Per-core VMEM capacity; conservative 64 MiB (v7x/TC) fallback."""
    try:
        return int(pltpu.get_tpu_info().vmem_capacity_bytes)
    except Exception:  # non-TPU backend / older runtime: assume the smallest (v7x)
        return 64 * 1024 * 1024


def _select_tile_m(b, dim, budget_bytes):
    """Largest anchor-row tile from {512,...,8} dividing b whose live set fits."""
    divisors = [t for t in (512, 256, 128, 64, 32, 16, 8) if b % t == 0]
    for tm in divisors:
        est = (
            8 * tm * dim      # anchor + positive bf16 tiles, double-buffered
            + 4 * b * dim     # resident bf16 [2b, dim] contrast slab, single-buffered
            + 32 * tm * b     # ~4 live f32/int32 [tm, 2b] intermediates
        )
        if est <= budget_bytes:
            return tm
    # TODO(synk): for very large global batches (bf16 slab > ~1/3 of per-core
    # VMEM, hit first on v7x's 64 MiB/TC) add a second grid axis over 2b column
    # blocks with flash-style online max/sum instead of a resident slab.
    return divisors[-1] if divisors else b


def _simclr_kernel(anchor_ref, pos_ref, contrast_ref, out_ref, *, inv_temp):
    tm = anchor_ref.shape[0]
    two_b = contrast_ref.shape[0]

    # 1/T folded into the small bf16 [tm, dim] anchor tile (not the [tm, 2b] dot).
    anchor = anchor_ref[...] * jnp.asarray(inv_temp, dtype=anchor_ref.dtype)

    # logits = (anchor / T) @ contrast^T : bf16 x bf16 -> f32 on the MXU at full
    # rate, contracting the feature dim of both operands (flash-attention style).
    dot = lax.dot_general(
        anchor, contrast_ref[...],
        dimension_numbers=(((1,), (1,)), ((), ())),
        preferred_element_type=jnp.float32,
    )

    # Numerical-stability shift; max includes the self column (matches reference).
    row_max = jnp.max(dot, axis=1, keepdims=True)

    # Positive logit = <anchor/T, other view> straight on the VPU over [tm, dim]
    # (no [tm, 2b] positive-mask materialization / reduce).
    pos_logit = jnp.sum(
        anchor.astype(jnp.float32) * pos_ref[...].astype(jnp.float32),
        axis=1, keepdims=True)

    # Self-column exclusion: ONE [tm, 2b] column iota vs. a [tm, 1] row-id column.
    # Contrast is in cat order, so anchor row r's self column is global row r.
    # (Select kept instead of exp-subtraction to avoid cancellation when every
    # non-self logit underflows.)
    row0 = pl.program_id(0) * tm
    col_ids = lax.broadcasted_iota(jnp.int32, (tm, two_b), 1)
    self_col = lax.broadcasted_iota(jnp.int32, (tm, 1), 0) + row0
    shifted = jnp.where(col_ids == self_col, jnp.float32(-1e30), dot - row_max)

    # TODO(synk): on v6e/v7x a bf16 EUP exp (with f32 accumulation) would shorten
    # the binding exp slot; kept f32 here for accuracy and v5e portability.
    log_denom = jnp.log(jnp.sum(jnp.exp(shifted), axis=1, keepdims=True))

    # Per-tile partial sum of positive log-probs as a single SMEM scalar
    # (replaces masked (tm,1) VMEM stores); wrapper takes -sum / b.
    out_ref[0, 0] = jnp.sum((pos_logit - row_max) - log_denom)


@functools.partial(jax.jit, static_argnames=("temperature",))
def simclr_loss(features, temperature=0.07):
    """features: [b, 2, dim] -> scalar float32 SimCLR loss (forward only)."""
    # TODO(synk): training use needs a custom_vjp (pallas_call has no VJP rule).
    b, n, dim = features.shape
    assert n == 2, "SimCLR requires exactly 2 views per sample"

    vmem_cap = _vmem_capacity_bytes()
    tm = _select_tile_m(b, dim, budget_bytes=int(vmem_cap * 0.6))
    nt = b // tm  # tm always divides b by construction

    # Single fused wrapper relayout: [b,2,dim] f32 -> [2b,dim] bf16 in cat order
    # (all view-0 rows, then all view-1 rows).  This one array serves as the
    # anchor tiles, the positive tiles and the resident contrast slab.
    contrast = jnp.swapaxes(features, 0, 1).reshape(2 * b, dim).astype(jnp.bfloat16)

    partials = pl.pallas_call(
        functools.partial(_simclr_kernel, inv_temp=float(1.0 / temperature)),
        grid=(nt,),
        in_specs=[
            pl.BlockSpec((tm, dim), lambda i: (i, 0)),          # anchor rows (view 0)
            pl.BlockSpec((tm, dim), lambda i: (i + nt, 0)),     # positive rows (view 1)
            pl.BlockSpec((2 * b, dim), lambda i: (0, 0),        # resident contrast slab,
                         pipeline_mode=pl.Buffered(1)),         #   single-buffered
        ],
        out_specs=pl.BlockSpec((1, 1), lambda i: (i, 0),
                               memory_space=pltpu.MemorySpace.SMEM),
        out_shape=jax.ShapeDtypeStruct((nt, 1), jnp.float32),
        compiler_params=pltpu.CompilerParams(
            dimension_semantics=("parallel",),       # disjoint outputs: megacore safe
            vmem_limit_bytes=int(vmem_cap * 0.85),
        ),
    )(contrast, contrast, contrast)

    return -jnp.sum(partials) / b


def _simclr_loss_ref(features, temperature=0.07):
    """Pure-JAX f32 reference matching the PyTorch module semantics."""
    b, n, dim = features.shape
    anchor = features[:, 0, :]
    contrast = jnp.concatenate([features[:, 0, :], features[:, 1, :]], axis=0)
    dot = jnp.matmul(anchor, contrast.T, precision=jax.lax.Precision.HIGHEST) / temperature
    logits = dot - lax.stop_gradient(jnp.max(dot, axis=1, keepdims=True))
    mask = jnp.tile(jnp.eye(b, dtype=jnp.float32), (1, 2))
    logits_mask = jnp.ones((b, 2 * b), jnp.float32).at[jnp.arange(b), jnp.arange(b)].set(0.0)
    mask = mask * logits_mask
    exp_logits = jnp.exp(logits) * logits_mask
    log_prob = logits - jnp.log(exp_logits.sum(1, keepdims=True))
    return -jnp.mean((mask * log_prob).sum(1) / mask.sum(1))


if __name__ == "__main__":
    key = jax.random.PRNGKey(0)
    b, dim = 16, 32
    features = jax.random.normal(key, (b, 2, dim), dtype=jnp.float32)
    # SimCLR consumes L2-normalized projections; unnormalized N(0,1) features at
    # T=0.07 make even the f32 reference NaN (exp underflow -> log(0)), so the
    # test inputs are normalized.  The loss module itself is unchanged.
    features = features / jnp.linalg.norm(features, axis=-1, keepdims=True)

    loss = simclr_loss(features, temperature=0.07)
    jax.block_until_ready(loss)

    ref = _simclr_loss_ref(features, temperature=0.07)
    assert jnp.isfinite(loss), loss
    # Kernel contracts in bf16 on the MXU (review item 1); tolerance is relaxed
    # accordingly vs. the f32 HIGHEST-precision reference.
    assert jnp.allclose(loss, ref, rtol=5e-2, atol=5e-2), (loss, ref)

    print("KERNEL_OK")
</pallas_src>

<mosaic_0001>
module attributes {stable_mosaic.version = 11 : i64} {
  func.func @_simclr_kernel(%arg0: i32, %arg1: memref<16x32xbf16, #tpu.memory_space<vmem>>, %arg2: memref<16x32xbf16, #tpu.memory_space<vmem>>, %arg3: memref<32x32xbf16, #tpu.memory_space<vmem>>, %arg4: memref<1x1xf32, #tpu.memory_space<smem>>) attributes {dimension_semantics = [#tpu.dimension_semantics<parallel>], iteration_bounds = array<i64: 1>, scalar_prefetch = 0 : i64, scratch_operands = 0 : i64, tpu.core_type = #tpu.core_type<tc>, window_params = [{transform_indices = @transform_0, window_bounds = array<i64: 16, 32>}, {transform_indices = @transform_1, window_bounds = array<i64: 16, 32>}, {pipeline_mode = #tpu.pipeline_mode<synchronous>, transform_indices = @transform_2, window_bounds = array<i64: 32, 32>}, {transform_indices = @transform_3, window_bounds = array<i64: 1, 1>}]} {
    %c0 = arith.constant 0 : index
    %c0_0 = arith.constant 0 : index
    %0 = vector.load %arg1[%c0, %c0_0] : memref<16x32xbf16, #tpu.memory_space<vmem>>, vector<16x32xbf16>
    %cst = arith.constant 1.431250e+01 : bf16
    %1 = vector.broadcast %cst : bf16 to vector<16x32xbf16>
    %2 = arith.mulf %0, %1 : vector<16x32xbf16>
    %c0_1 = arith.constant 0 : index
    %c0_2 = arith.constant 0 : index
    %3 = vector.load %arg3[%c0_1, %c0_2] : memref<32x32xbf16, #tpu.memory_space<vmem>>, vector<32x32xbf16>
    %cst_3 = arith.constant dense<0.000000e+00> : vector<16x32xf32>
    %4 = tpu.matmul %2, %3, %cst_3 {dimension_numbers = #tpu.dot_dimension_numbers<[1], [1], [0], [0], [0, 0, 1, 0], [], []>} : vector<16x32xbf16>, vector<32x32xbf16>, vector<16x32xf32> -> vector<16x32xf32>
    %cst_4 = arith.constant dense<0xFF800000> : vector<16xf32>
    %5 = vector.multi_reduction <maximumf>, %4, %cst_4 [1] : vector<16x32xf32> to vector<16xf32>
    %6 = vector.shape_cast %5 : vector<16xf32> to vector<16x1xf32>
    %7 = arith.extf %2 : vector<16x32xbf16> to vector<16x32xf32>
    %c0_5 = arith.constant 0 : index
    %c0_6 = arith.constant 0 : index
    %8 = vector.load %arg2[%c0_5, %c0_6] : memref<16x32xbf16, #tpu.memory_space<vmem>>, vector<16x32xbf16>
    %9 = arith.extf %8 : vector<16x32xbf16> to vector<16x32xf32>
    %10 = arith.mulf %7, %9 : vector<16x32xf32>
    %cst_7 = arith.constant dense<0.000000e+00> : vector<16xf32>
    %11 = vector.multi_reduction <add>, %10, %cst_7 [1] : vector<16x32xf32> to vector<16xf32>
    %12 = vector.shape_cast %11 : vector<16xf32> to vector<16x1xf32>
    %c16_i32 = arith.constant 16 : i32
    %13 = arith.muli %arg0, %c16_i32 : i32
    %14 = tpu.iota {dimensions = array<i32: 1>} : vector<16x32xi32>
    %15 = tpu.iota {dimensions = array<i32: 0>} : vector<16x1xi32>
    %16 = vector.broadcast %13 : i32 to vector<16x1xi32>
    %17 = arith.addi %15, %16 : vector<16x1xi32>
    %18 = vector.broadcast %17 : vector<16x1xi32> to vector<16x32xi32>
    %19 = arith.cmpi eq, %14, %18 : vector<16x32xi32>
    %20 = vector.broadcast %6 : vector<16x1xf32> to vector<16x32xf32>
    %21 = arith.subf %4, %20 : vector<16x32xf32>
    %cst_8 = arith.constant -1.000000e+30 : f32
    %22 = vector.broadcast %cst_8 : f32 to vector<16x32xf32>
    %23 = arith.select %19, %22, %21 : vector<16x32xi1>, vector<16x32xf32>
    %24 = math.exp %23 : vector<16x32xf32>
    %cst_9 = arith.constant dense<0.000000e+00> : vector<16xf32>
    %25 = vector.multi_reduction <add>, %24, %cst_9 [1] : vector<16x32xf32> to vector<16xf32>
    %26 = vector.shape_cast %25 : vector<16xf32> to vector<16x1xf32>
    %27 = math.log %26 : vector<16x1xf32>
    %28 = arith.subf %12, %6 : vector<16x1xf32>
    %29 = arith.subf %28, %27 : vector<16x1xf32>
    %30 = vector.shape_cast %29 : vector<16x1xf32> to vector<1x16x1xf32>
    %cst_10 = arith.constant dense<0.000000e+00> : vector<1xf32>
    %31 = vector.multi_reduction <add>, %30, %cst_10 [1, 2] : vector<1x16x1xf32> to vector<1xf32>
    %32 = vector.shape_cast %31 : vector<1xf32> to vector<1x1x1xf32>
    %33 = vector.extract %32[0, 0, 0] : f32 from vector<1x1x1xf32>
    %c0_11 = arith.constant 0 : index
    %c0_12 = arith.constant 0 : index
    %34 = memref.load %arg4[%c0_11, %c0_12] : memref<1x1xf32, #tpu.memory_space<smem>>
    memref.store %33, %arg4[%c0_11, %c0_12] : memref<1x1xf32, #tpu.memory_space<smem>>
    return
  }
  func.func @transform_0(%arg0: i32) -> (i32, i32) {
    %c0_i32 = arith.constant 0 : i32
    %c0_i32_0 = arith.constant 0 : i32
    return %arg0, %c0_i32 : i32, i32
  }
  func.func @transform_1(%arg0: i32) -> (i32, i32) {
    %c1_i32 = arith.constant 1 : i32
    %0 = arith.addi %arg0, %c1_i32 : i32
    %c0_i32 = arith.constant 0 : i32
    %c0_i32_0 = arith.constant 0 : i32
    return %0, %c0_i32 : i32, i32
  }
  func.func @transform_2(%arg0: i32) -> (i32, i32) {
    %c0_i32 = arith.constant 0 : i32
    %c0_i32_0 = arith.constant 0 : i32
    %c0_i32_1 = arith.constant 0 : i32
    return %c0_i32, %c0_i32_0 : i32, i32
  }
  func.func @transform_3(%arg0: i32) -> (i32, i32) {
    %c0_i32 = arith.constant 0 : i32
    %c0_i32_0 = arith.constant 0 : i32
    return %arg0, %c0_i32 : i32, i32
  }
}

</mosaic_0001>

<bundles_post_ra>
// kernel: simclr_loss.1
= control target key start
LH: loop header
LB: loop body
LE: loop exit
PB: predicated region body
PF: predicated region fallthrough
CT: control target
= control target key end

     0   :  { %v249_v1 = vmov 0.0   ;;  %vm62_vm0 = vcmask 261120   ;;  %vm250_vm1 = vmmov 0   ;;  %s308_s0 = inlined_call_operand.vmem [shape: bf16[32,32], index: 0, kind: input, shape index: {}, may-alias: {0,1,2}]   ;;  %s309_s1 = inlined_call_operand.vmem [shape: bf16[32,32], index: 1, kind: input, shape index: {}, may-alias: {0,1,2}]   ;;  %s310_s2 = inlined_call_operand.vmem [shape: bf16[32,32], index: 2, kind: input, shape index: {}, may-alias: {0,1,2}]   ;;  %s311_s3 = inlined_call_operand.hbm [shape: f32[1,1], index: 3, kind: output, shape index: {}]  }
   0x1   :  { %v227_v0 = vld [vmem:[%s310_s2] sm:$0xff]   ;;  %214 = vmatprep.subr.bf16.mxu0 %v249_v1  ;;  %218 = vmatprep.mubr.msk.bf16.mxu0 %vm250_vm1, %v249_v1  ;;  %v228_v3 = vld [vmem:[%s310_s2 + $0x8] sm:$0xff]  }
   0x2   :  { %v67_v2 = vsel %vm62_vm0, %v227_v0, 0 }
   0x3   :  { %215 = vmatpush3.bf16.xpose.msra.mxu0 %v67_v2 }
   0x4   :  { %216 = vmatprep.subr.bf16.mxu0 %v249_v1 }
   0x5   :  { %8 = vsyncpa [#allocation3], 0  ;;  %v39_v4 = vld [vmem:[%s308_s0] sm:$0xf]  ;;  %v40_v5 = vld [vmem:[%s308_s0 + $0x4] sm:$0xf]  ;;  %v134_v21 = vlaneseq }
   0x6   :  { %v70_v6 = vsel %vm62_vm0, %v228_v3, 0  ;;  %v41_v7 = vmul.bf16 1097154917, %v39_v4  ;;  %v42_v8 = vmul.bf16 1097154917, %v40_v5  ;;  %v210_v10 = vld [vmem:[%s309_s1 + $0x8] sm:$0xff]  }
   0x7   :  { %v208_v12 = vunpack.c.l.bf16 %v210_v10  ;;  %v135_v22 = vand.u32 127, %v134_v21  ;;  %v137_v23 = vshrl.u32 %v134_v21, 7  ;;  %v209_v34 = vunpack.c.h.bf16 %v210_v10  ;;  %s237_s22 = scalar_lea.hbm %s311_s3, 16 }
   0x8   :  { %v200_v9 = vcombine.low %v41_v7, %v42_v8  ;;  %v119_v11 = vunpack.c.l.bf16 %v41_v7  ;;  %v120_v33 = vunpack.c.l.bf16 %v42_v8  ;;  %vm166_vm4 = vcmask 7168   ;;  %p238_p0 = scmp.ne.s32.totalorder %s311_s3, %s237_s22  ;;  %p241_p1 = scmp.lt.u32.totalorder %s237_s22, %s311_s3 }
   0x9   :  { %vm142_vm2 = vcmp.eq.s32.totalorder %v135_v22, %v137_v23  ;;  %v138_v25 = vadd.s32 8, %v137_v23 }
   0xa   :  { %v125_v18 = vmul.f32 %v208_v12, %v119_v11  ;;  %v126_v37 = vmul.f32 %v209_v34, %v120_v33  ;;  %p243_p2 = pnand %p241_p1, %p238_p0 }
   0xb   :  { %217 = vmatpush3.bf16.xpose.msra.mxu0 %v70_v6  ;;  %vm143_vm3 = vcmp.eq.s32.totalorder %v135_v22, %v138_v25 }
   0xc   :  { %v127_v20 = vsel %vm62_vm0, %v125_v18, 0.0  ;;  %v130_v40 = vsel %vm62_vm0, %v126_v37, 0.0 }
  0x12   :  { %219 = vmatmul.mubr.msk.bf16.vlgmr.msra.gmra.mrb[0].mxu0 %vm62_vm0, %v200_v9 }
  0xe5   :  { %v106_v13 = vpop.f32.mrb[0].mxu0 }
  0xe6   :  { %v220_v14 = vpop.f32.mrb[1].mxu0  ;;  %v113_v15 = vsel %vm62_vm0, %v106_v13, -inf }
  0xe7   :  { %114 = vmax.xlane.f32.xlu0 %v113_v15  ;;  %v109_v16 = vpop.f32.mrb[2].mxu0 }
  0xe8   :  { %v221_v17 = vpop.f32.mrb[3].mxu0  ;;  %v116_v19 = vsel %vm62_vm0, %v109_v16, -inf }
  0xeb   :  { %117 = vmax.xlane.f32.xlu0 %v116_v19 }
  0xef   :  { %128 = vadd.xlane.f32.xlu0 %v127_v20 }
 0x174   :  { %v115_v24 = vpop.xlane.xlu0 %114 }
 0x175   :  { %v144_v26 = vsub.f32 %v106_v13, %v115_v24 }
 0x177   :  { %v146_v27 = vsel %vm142_vm2, -1e+30, %v144_v26 }
 0x178   :  { %v148_v28 = vmul.f32 1.442695, %v146_v27  ;;  %v118_v29 = vpop.xlane.xlu0 %117 }
 0x179   :  { %v145_v30 = vsub.f32 %v109_v16, %v118_v29 }
 0x17a   :  { %229 = vpow2.f32 %v148_v28 }
 0x17b   :  { %v147_v31 = vsel %vm143_vm3, -1e+30, %v145_v30 }
 0x17c   :  { %v150_v32 = vmul.f32 1.442695, %v147_v31  ;;  %v129_v44 = vpop.xlane.xlu0 %128 }
 0x17d   :  { %v162_v47 = vsub.f32 %v129_v44, %v115_v24 }
 0x17e   :  { %231 = vpow2.f32 %v150_v32 }
 0x184   :  { %v230_v35 = vpop.eup %229 }
 0x185   :  { %v152_v36 = vsel %vm62_vm0, %v230_v35, 0.0 }
 0x186   :  { %153 = vadd.xlane.f32.xlu1 %v152_v36 }
 0x188   :  { %v232_v38 = vpop.eup %231 }
 0x189   :  { %v155_v39 = vsel %vm62_vm0, %v232_v38, 0.0 }
 0x18a   :  { %156 = vadd.xlane.f32.xlu1 %v155_v39 }
 0x18e   :  { %131 = vadd.xlane.f32.xlu1 %v130_v40 }
 0x213   :  { %v154_v41 = vpop.xlane.xlu1 %153 }
 0x214   :  { %233 = vlog2.f32 %v154_v41 }
 0x217   :  { %v157_v42 = vpop.xlane.xlu1 %156 }
 0x218   :  { %235 = vlog2.f32 %v157_v42 }
 0x21b   :  { %v132_v46 = vpop.xlane.xlu1 %131 }
 0x21c   :  { %v163_v50 = vsub.f32 %v132_v46, %v118_v29 }
 0x21e   :  { %v234_v43 = vpop.eup %233 }
 0x21f   :  { %v159_v45 = vmul.f32 0.6931472, %v234_v43 }
 0x221   :  { %v164_v51 = vsub.f32 %v162_v47, %v159_v45 }
 0x222   :  { %v236_v48 = vpop.eup %235 }
 0x223   :  { %v161_v49 = vmul.f32 0.6931472, %v236_v48  ;;  %v167_v53 = vsel %vm166_vm4, %v164_v51, 0.0 }
 0x225   :  { %v165_v52 = vsub.f32 %v163_v50, %v161_v49 }
 0x227   :  { %v168_v54 = vsel %vm166_vm4, %v165_v52, 0.0 }
 0x228   :  { %v169_v55 = vadd.f32 %v168_v54, %v167_v53 }
 0x22a   :  { %170 = vadd.xlane.f32.xlu0 %v169_v55 }
 0x2b7   :  { %v171_v56 = vpop.xlane.xlu0 %170 }
 0x2b8   :  { %v172_v57 = vrot.slane %v171_v56, 4 }
 0x2ba   :  { %v173_v58 = vadd.f32 %v172_v57, %v171_v56 }
 0x2bc   :  { %v174_v59 = vrot.slane %v173_v58, 2 }
 0x2be   :  { %v175_v60 = vadd.f32 %v174_v59, %v173_v58 }
 0x2c0   :  { %v176_v61 = vrot.slane %v175_v60, 1 }
 0x2c2   :  { %v177_v62 = vadd.f32 %v176_v61, %v175_v60 }
 0x2c4   :  { %222 = vpush %v177_v62 }
 0x2f5   :  { %s223_s0 = spop %222 }
 0x2f6   :  { %180 = sst [smem:[#allocation2]] %s223_s0 }
 0x2f7   :  { %246 = shalt.err (!%p243_p2)
}
 0x2f8   :  { %s251_s27 = smov [#allocation2]  }
 0x2f9   :  { %188 = dma.smem_to_hbm %s251_s27, 16, %s311_s3, [#allocation3]  }
 0x2fa   :  { %247 = dma.done.wait [#allocation3], 16  }
 0x2fb   :  { %248 = vsyncadd [#allocation3], 4294967280 }
 0x2fc   :  { %192 = sfence }
 0x2fd   :  { %193 = vsyncpa [#allocation3], 1 }

</bundles_post_ra>
